<compile_context>
chip_gen: v7x
topology: tpu7x:2x2x1
jax: 0.10.0
libtpu: 0.0.40
codegen_flags: <defaults>
</compile_context>

<pallas_src>
import jax
import jax.numpy as jnp
from jax.experimental import pallas as pl
from jax.experimental.pallas import tpu as pltpu

_LANES = 128        # TPU vreg lane width
_MAX_COLS = 2048    # lane-dense column cap (multiple of 128)
_SUBLANE_PACK = 32  # row-tile multiple keeping int8/fp8/bf16 packing aligned


def _identity_kernel(x_ref, o_ref):
    # Elementwise pass-through of the current (row_tile, cols) tile.  A
    # concrete BaseModel subclass would replace this body with real compute.
    o_ref[...] = x_ref[...]


def _choose_cols(total_elems: int) -> int:
    """Largest power-of-2 multiple of 128 that divides total_elems, <= cap."""
    cols = _LANES
    while cols * 2 <= _MAX_COLS and total_elems % (cols * 2) == 0:
        cols *= 2
    return cols


def _vmem_capacity_bytes() -> int:
    """Per-core VMEM capacity; conservative (v7x) fallback if query fails."""
    try:
        return int(pltpu.get_tpu_info().vmem_capacity_bytes)
    except Exception:
        return 64 * 1024 * 1024


def _identity_pallas(x: jax.Array) -> jax.Array:
    """Lane-dense, byte-sized-tiled identity copy through a Pallas kernel."""
    orig_shape = x.shape
    orig_dtype = x.dtype
    total = x.size
    if total == 0:
        return x

    if total % _LANES != 0:
        # True identity: returning x is the zero-HBM-traffic optimum, and it
        # avoids the pad/slice wrapper that added ~2 extra full HBM passes.
        # TODO(synk): a concrete subclass with real compute would instead rely
        # on Pallas partial-block masking for ragged shapes.
        return x

    itemsize = jnp.dtype(orig_dtype).itemsize
    vmem_cap = _vmem_capacity_bytes()

    # Generation-aware budgets:
    #   block target  ~ cap/16  (v7x: 4 MiB, v5e/v6e: 8 MiB) — on the measured
    #                   tile-size plateau; 2 refs x 2 buffers stays << limit.
    #   scoped VMEM   ~ cap/2, clamped to [32 MiB, 96 MiB].
    target_block_bytes = min(8 * 1024 * 1024, vmem_cap // 16)
    vmem_limit_bytes = min(96 * 1024 * 1024, max(32 * 1024 * 1024, vmem_cap // 2))

    cols = _choose_cols(total)
    rows = total // cols
    x2 = x.reshape(rows, cols)

    max_rows_per_block = (target_block_bytes // (cols * itemsize))
    max_rows_per_block = max(_SUBLANE_PACK,
                             (max_rows_per_block // _SUBLANE_PACK) * _SUBLANE_PACK)

    if rows <= max_rows_per_block:
        row_tile = rows            # single block; full-dim exception on sublanes
    else:
        row_tile = max_rows_per_block  # multiple of 32 -> packed dtypes stay aligned

    grid = (pl.cdiv(rows, row_tile),)  # partial last block is masked by Pallas
    block = (row_tile, cols)

    cost = pl.CostEstimate(
        flops=0,
        transcendentals=0,
        bytes_accessed=2 * total * itemsize,  # honest read + write traffic
    )

    y2 = pl.pallas_call(
        _identity_kernel,
        out_shape=jax.ShapeDtypeStruct((rows, cols), orig_dtype),
        grid_spec=pltpu.PrefetchScalarGridSpec(
            num_scalar_prefetch=0,
            grid=grid,
            in_specs=[pl.BlockSpec(block, lambda i: (i, 0))],
            out_specs=pl.BlockSpec(block, lambda i: (i, 0)),
        ),
        compiler_params=pltpu.CompilerParams(
            # Near-neutral perf hint; no cross-TC sharding is claimed here.
            dimension_semantics=("parallel",),
            vmem_limit_bytes=vmem_limit_bytes,
        ),
        cost_estimate=cost,
    )(x2)

    return y2.reshape(orig_shape)


def base_model_forward(x: jax.Array) -> jax.Array:
    """Identity forward for the abstract BaseModel via the Pallas kernel.

    Production note: for a *true* identity the cheapest implementation is to
    return `x` unchanged (zero HBM traffic); the Pallas path is kept as the
    scaffolding a concrete subclass would replace with real compute.
    """
    return _identity_pallas(x)


class BaseModelPallas:
    """Mirror of the (abstract) torch BaseModel: no parameters."""

    def __init__(self):
        # BaseModel.__init__ only calls super().__init__(); no parameters.
        pass

    def forward(self, x: jax.Array) -> jax.Array:
        return base_model_forward(x)

    def reset(self):
        # No parameters to re-initialise in the abstract base class.
        return None

    __call__ = forward


if __name__ == "__main__":
    key = jax.random.PRNGKey(0)
    # Small NCHW input consistent with a typical conv-style subclass.
    x = jax.random.normal(key, (2, 4, 16, 16), dtype=jnp.float32)

    model = BaseModelPallas()
    y = jax.block_until_ready(model(x))

    # Sanity check: identity semantics (shape, dtype, values preserved).
    assert y.shape == x.shape and y.dtype == x.dtype
    assert bool(jnp.all(y == x))

    print("KERNEL_OK")
</pallas_src>

<mosaic_0001>
module attributes {stable_mosaic.version = 11 : i64} {
  func.func @_identity_kernel(%arg0: i32, %arg1: memref<1x2048xf32, #tpu.memory_space<vmem>>, %arg2: memref<1x2048xf32, #tpu.memory_space<vmem>>) attributes {dimension_semantics = [#tpu.dimension_semantics<parallel>], iteration_bounds = array<i64: 1>, scalar_prefetch = 0 : i64, scratch_operands = 0 : i64, tpu.core_type = #tpu.core_type<tc>, window_params = [{transform_indices = @transform_0, window_bounds = array<i64: 1, 2048>}, {transform_indices = @transform_1, window_bounds = array<i64: 1, 2048>}]} {
    %c0 = arith.constant 0 : index
    %c0_0 = arith.constant 0 : index
    %0 = vector.load %arg1[%c0, %c0_0] : memref<1x2048xf32, #tpu.memory_space<vmem>>, vector<1x2048xf32>
    %c0_1 = arith.constant 0 : index
    %c0_2 = arith.constant 0 : index
    %1 = vector.load %arg2[%c0_1, %c0_2] : memref<1x2048xf32, #tpu.memory_space<vmem>>, vector<1x2048xf32>
    tpu.vector_store %arg2[%c0_1, %c0_2], %0 {strides = array<i32>} : memref<1x2048xf32, #tpu.memory_space<vmem>>, vector<1x2048xf32>,
    return
  }
  func.func @transform_0(%arg0: i32) -> (i32, i32) {
    %c0_i32 = arith.constant 0 : i32
    %c0_i32_0 = arith.constant 0 : i32
    return %arg0, %c0_i32 : i32, i32
  }
  func.func @transform_1(%arg0: i32) -> (i32, i32) {
    %c0_i32 = arith.constant 0 : i32
    %c0_i32_0 = arith.constant 0 : i32
    return %arg0, %c0_i32 : i32, i32
  }
}

</mosaic_0001>

<bundles_post_ra>
// kernel: tpu_custom_call.1
= control target key start
LH: loop header
LB: loop body
LE: loop exit
PB: predicated region body
PF: predicated region fallthrough
CT: control target
= control target key end

     0   :  { %6 = vsyncpa [#allocation3], 0  ;;  %s126_s0 = inlined_call_operand.hbm [shape: f32[1,2048], index: 0, kind: input, shape index: {}]   ;;  %s127_s1 = inlined_call_operand.hbm [shape: f32[1,2048], index: 1, kind: output, shape index: {}]  }
   0x1   :  { %7 = vsyncpa [#allocation4], 0  ;;  %s90_s6 = smov [#allocation2]   ;;  %s42_s10 = scalar_lea.hbm %s126_s0, 256 }
   0x2   :  { %s14_s7 = sshll.u32 %s90_s6, 4  ;;  %p43_p0 = scmp.ne.s32.totalorder %s126_s0, %s42_s10  ;;  %s15_s7 = int_to_ptr.vmem [resolvable:$true] %s14_s7 }
   0x3   :  { %p46_p1 = scmp.lt.u32.totalorder %s42_s10, %s126_s0 }
   0x5   :  { %p48_p2 = pnand %p46_p1, %p43_p0 }
   0x7   :  { %51 = shalt.err (!%p48_p2)
}
   0x8   :  { %s52_s15 = scalar_lea.vmem %s15_s7, 256  ;;  %p57_p4 = scmp.lt.s32.totalorder %s15_s7, %s15_s7 }
   0x9   :  { %p53_p3 = scmp.ne.s32.totalorder %s15_s7, %s52_s15  ;;  %p58_p5 = scmp.lt.s32.totalorder %s52_s15, %s52_s15 }
   0xb   :  { %p59_p6 = por %p58_p5, %p57_p4 }
   0xd   :  { %p60_p7 = pnand %p59_p6, %p53_p3 }
   0xf   :  { %63 = shalt.err (!%p60_p7)
}
  0x10   :  { %17 = dma.hbm_to_vmem [thread:$0]  %s126_s0, 256, %s15_s7, [#allocation3]  }
  0x11   :  { %86 = dma.done.wait [#allocation3], 256  }
  0x12   :  { %87 = vsyncadd [#allocation3], 4294967040  ;;  %s91_s18 = smov [#allocation5]   ;;  %v21_v0 = vld [vmem:[#allocation2] sm:$0xff]  ;;  %v22_v1 = vld [vmem:[#allocation2 + $0x8] sm:$0xff] }
  0x13   :  { %s31_s19 = sshll.u32 %s91_s18, 4  ;;  %23 = vst [vmem:[#allocation5] sm:$0xff] %v21_v0  ;;  %24 = vst [vmem:[#allocation5 + $0x8] sm:$0xff] %v22_v1  ;;  %s32_s19 = int_to_ptr.vmem [resolvable:$true] %s31_s19 }
  0x14   :  { %s64_s20 = scalar_lea.vmem %s32_s19, 256  ;;  %p69_p9 = scmp.lt.s32.totalorder %s32_s19, %s32_s19 }
  0x15   :  { %p65_p8 = scmp.ne.s32.totalorder %s32_s19, %s64_s20  ;;  %p70_p10 = scmp.lt.s32.totalorder %s64_s20, %s64_s20 }
  0x17   :  { %p71_p11 = por %p70_p10, %p69_p9 }
  0x19   :  { %p72_p12 = pnand %p71_p11, %p65_p8 }
  0x1b   :  { %75 = shalt.err (!%p72_p12)
}
  0x1c   :  { %s76_s0 = scalar_lea.hbm %s127_s1, 256 }
  0x1d   :  { %p77_p13 = scmp.ne.s32.totalorder %s127_s1, %s76_s0  ;;  %p80_p0 = scmp.lt.u32.totalorder %s76_s0, %s127_s1 }
  0x1f   :  { %p82_p1 = pnand %p80_p0, %p77_p13 }
  0x21   :  { %85 = shalt.err (!%p82_p1)
}
  0x22   :  { %34 = dma.vmem_to_hbm [thread:$0]  %s32_s19, 256, %s127_s1, [#allocation4]  }
  0x23   :  { %88 = dma.done.wait [#allocation4], 256  }
  0x24   :  { %89 = vsyncadd [#allocation4], 4294967040 }
  0x25   :  { %38 = vsyncpa [#allocation3], 1 }
  0x26   :  { %39 = vsyncpa [#allocation4], 1 }

</bundles_post_ra>
